<compile_context>
chip_gen: v6e
topology: v6e:2x2x1
jax: 0.10.0
libtpu: 0.0.40
codegen_flags: <defaults>
</compile_context>

<pallas_src>
import functools

import jax
import jax.numpy as jnp
from jax.experimental import pallas as pl
from jax.experimental.pallas import tpu as pltpu

_D_IN = 400     # real input feature width (fixed by the architecture)
_D_INP = 512    # padded contraction width for fc1 (multiple of 128)
_H = 128        # padded hidden width (real 100 / 50) and padded output width (real 1)
_TILE = 128     # batch rows per grid step


# ----------------------------------------------------------------------------- the kernel
def _classifier_kernel(x_ref, w1_ref, w2_ref, w3_ref, b_ref, out_ref):
    f32, bf16 = jnp.float32, jnp.bfloat16
    b1 = b_ref[0:1, :]                                   # (1, 128) fc1 bias (100 real lanes)
    b2 = b_ref[1:2, :]                                   # (1, 128) fc2 bias (50 real lanes)
    b3 = b_ref[2:3, :]                                   # (1, 128) fc3 bias (1 real lane)

    x = x_ref[...]                                                         # (TILE, 512) bf16
    h = jnp.dot(x, w1_ref[...], preferred_element_type=f32) + b1           # (TILE, 128) f32
    h = jnp.maximum(h, 0.0).astype(bf16)
    h = jnp.dot(h, w2_ref[...], preferred_element_type=f32) + b2           # (TILE, 128) f32
    h = jnp.maximum(h, 0.0).astype(bf16)
    y = jnp.dot(h, w3_ref[...], preferred_element_type=f32) + b3           # (TILE, 128), col 0 real
    out_ref[...] = jax.nn.sigmoid(y)


# ----------------------------------------------------------------------------- param packing
def pack_params(params):
    """Pad / transpose PyTorch-layout Linear params into lane-aligned kernel buffers (once)."""
    f32, bf16 = jnp.float32, jnp.bfloat16

    def pad_t(w, shape):
        wt = jnp.asarray(w, f32).T                       # PyTorch (out, in) -> (in, out)
        return jnp.zeros(shape, f32).at[: wt.shape[0], : wt.shape[1]].set(wt)

    w1 = pad_t(params["cfc1_w"], (_D_INP, _H))           # (512, 128)
    w2 = pad_t(params["cfc2_w"], (_H, _H))               # (128, 128)
    w3 = pad_t(params["cfc3_w"], (_H, _H))               # (128, 128)

    b = jnp.zeros((8, _H), f32)
    b = b.at[0, :100].set(jnp.asarray(params["cfc1_b"], f32).reshape(-1))
    b = b.at[1, :50].set(jnp.asarray(params["cfc2_b"], f32).reshape(-1))
    b = b.at[2, :1].set(jnp.asarray(params["cfc3_b"], f32).reshape(-1))

    # Padding invariant: every padded weight row/col and bias lane is exactly zero, so padded
    # lanes of the hidden activations stay 0 through ReLU and never contaminate real lanes.
    assert float(jnp.max(jnp.abs(w1[_D_IN:, :]))) == 0.0
    assert float(jnp.max(jnp.abs(w1[:, 100:]))) == 0.0
    assert float(jnp.max(jnp.abs(w2[100:, :]))) == 0.0 and float(jnp.max(jnp.abs(w2[:, 50:]))) == 0.0
    assert float(jnp.max(jnp.abs(w3[50:, :]))) == 0.0 and float(jnp.max(jnp.abs(w3[:, 1:]))) == 0.0

    return dict(w1=w1.astype(bf16), w2=w2.astype(bf16), w3=w3.astype(bf16), b=b)


# ----------------------------------------------------------------------------- wrapper
@functools.partial(jax.jit, static_argnames=("tile",))
def classifier_forward(x, packed, *, tile=_TILE):
    """x: (B, 400) f32. Returns (B, 1) sigmoid probabilities (Classifier_neT.forward)."""
    f32, bf16 = jnp.float32, jnp.bfloat16
    B, D = x.shape
    assert D == _D_IN
    n_tiles = int(pl.cdiv(B, tile))
    Bp = n_tiles * tile

    # Zero-pad batch rows to the tile size and features 400 -> 512 (padded lanes stay 0).
    xp = jnp.zeros((Bp, _D_INP), bf16).at[:B, :D].set(x.astype(bf16))

    flops = 2 * Bp * (_D_INP * _H + _H * _H + _H * _H)
    bytes_accessed = (xp.size * 2 + packed["w1"].size * 2 + packed["w2"].size * 2
                      + packed["w3"].size * 2 + packed["b"].size * 4 + Bp * _H * 4)

    out = pl.pallas_call(
        _classifier_kernel,
        out_shape=jax.ShapeDtypeStruct((Bp, _H), f32),
        grid_spec=pltpu.PrefetchScalarGridSpec(
            num_scalar_prefetch=0,
            grid=(n_tiles,),
            in_specs=[
                pl.BlockSpec((tile, _D_INP), lambda i: (i, 0)),   # batch tile
                pl.BlockSpec((_D_INP, _H), lambda i: (0, 0)),     # w1: fetched once, VMEM-resident
                pl.BlockSpec((_H, _H), lambda i: (0, 0)),         # w2
                pl.BlockSpec((_H, _H), lambda i: (0, 0)),         # w3
                pl.BlockSpec((8, _H), lambda i: (0, 0)),          # packed biases
            ],
            out_specs=pl.BlockSpec((tile, _H), lambda i: (i, 0)),
        ),
        compiler_params=pltpu.CompilerParams(dimension_semantics=("parallel",)),
        cost_estimate=pl.CostEstimate(flops=flops, transcendentals=Bp * _H,
                                      bytes_accessed=bytes_accessed),
    )(xp, packed["w1"], packed["w2"], packed["w3"], packed["b"])

    return out[:B, :1]


# ----------------------------------------------------------------------------- reference + init
def classifier_reference(x, params):
    h = jnp.maximum(x @ jnp.asarray(params["cfc1_w"]).T + params["cfc1_b"], 0.0)
    h = jnp.maximum(h @ jnp.asarray(params["cfc2_w"]).T + params["cfc2_b"], 0.0)
    return jax.nn.sigmoid(h @ jnp.asarray(params["cfc3_w"]).T + params["cfc3_b"])


def init_params(key):
    ks = jax.random.split(key, 6)
    w = lambda k, shape: 0.05 * jax.random.normal(k, shape, jnp.float32)
    return dict(
        cfc1_w=w(ks[0], (100, 400)), cfc1_b=w(ks[1], (100,)),   # PyTorch (out, in) layout
        cfc2_w=w(ks[2], (50, 100)),  cfc2_b=w(ks[3], (50,)),
        cfc3_w=w(ks[4], (1, 50)),    cfc3_b=w(ks[5], (1,)),
    )


if __name__ == "__main__":
    key = jax.random.PRNGKey(0)
    k_x, k_x2, k_p = jax.random.split(key, 3)

    params = init_params(k_p)
    packed = pack_params(params)

    # Small demo batch at the module's natural shape (B, 400).
    x_small = jax.random.normal(k_x, (2, 400), jnp.float32)
    y_small = classifier_forward(x_small, packed)

    # Larger batch exercising multiple grid steps (3 tiles of 128 rows).
    x_big = jax.random.normal(k_x2, (300, 400), jnp.float32)
    y_big = classifier_forward(x_big, packed)

    jax.block_until_ready((y_small, y_big))

    ref_small = classifier_reference(x_small, params)
    ref_big = classifier_reference(x_big, params)

    assert y_small.shape == (2, 1) and y_big.shape == (300, 1)
    assert bool(jnp.all(jnp.isfinite(y_small))) and bool(jnp.all(jnp.isfinite(y_big)))
    assert float(jnp.max(jnp.abs(y_small - ref_small))) < 2e-2, "small-batch mismatch vs reference"
    assert float(jnp.max(jnp.abs(y_big - ref_big))) < 2e-2, "multi-tile mismatch vs reference"
    print("KERNEL_OK")
</pallas_src>

<mosaic_0001>
module attributes {stable_mosaic.version = 11 : i64} {
  func.func @_classifier_kernel(%arg0: i32, %arg1: memref<128x512xbf16, #tpu.memory_space<vmem>>, %arg2: memref<512x128xbf16, #tpu.memory_space<vmem>>, %arg3: memref<128x128xbf16, #tpu.memory_space<vmem>>, %arg4: memref<128x128xbf16, #tpu.memory_space<vmem>>, %arg5: memref<8x128xf32, #tpu.memory_space<vmem>>, %arg6: memref<128x128xf32, #tpu.memory_space<vmem>>) attributes {dimension_semantics = [#tpu.dimension_semantics<parallel>], iteration_bounds = array<i64: 1>, scalar_prefetch = 0 : i64, scratch_operands = 0 : i64, tpu.core_type = #tpu.core_type<tc>, window_params = [{transform_indices = @transform_0, window_bounds = array<i64: 128, 512>}, {pipeline_mode = #tpu.pipeline_mode<synchronous>, transform_indices = @transform_1, window_bounds = array<i64: 512, 128>}, {pipeline_mode = #tpu.pipeline_mode<synchronous>, transform_indices = @transform_2, window_bounds = array<i64: 128, 128>}, {pipeline_mode = #tpu.pipeline_mode<synchronous>, transform_indices = @transform_3, window_bounds = array<i64: 128, 128>}, {pipeline_mode = #tpu.pipeline_mode<synchronous>, transform_indices = @transform_4, window_bounds = array<i64: 8, 128>}, {transform_indices = @transform_5, window_bounds = array<i64: 128, 128>}]} {
    %c0 = arith.constant 0 : index
    %c0_0 = arith.constant 0 : index
    %0 = vector.load %arg5[%c0, %c0_0] : memref<8x128xf32, #tpu.memory_space<vmem>>, vector<1x128xf32>
    %c1 = arith.constant 1 : index
    %c0_1 = arith.constant 0 : index
    %1 = vector.load %arg5[%c1, %c0_1] : memref<8x128xf32, #tpu.memory_space<vmem>>, vector<1x128xf32>
    %c2 = arith.constant 2 : index
    %c0_2 = arith.constant 0 : index
    %2 = vector.load %arg5[%c2, %c0_2] : memref<8x128xf32, #tpu.memory_space<vmem>>, vector<1x128xf32>
    %c0_3 = arith.constant 0 : index
    %c0_4 = arith.constant 0 : index
    %3 = vector.load %arg1[%c0_3, %c0_4] : memref<128x512xbf16, #tpu.memory_space<vmem>>, vector<128x512xbf16>
    %c0_5 = arith.constant 0 : index
    %c0_6 = arith.constant 0 : index
    %4 = vector.load %arg2[%c0_5, %c0_6] : memref<512x128xbf16, #tpu.memory_space<vmem>>, vector<512x128xbf16>
    %cst = arith.constant dense<0.000000e+00> : vector<128x128xf32>
    %5 = tpu.matmul %3, %4, %cst {dimension_numbers = #tpu.dot_dimension_numbers<[1], [0], [0], [1], [0, 0, 1, 1], [], []>} : vector<128x512xbf16>, vector<512x128xbf16>, vector<128x128xf32> -> vector<128x128xf32>
    %6 = vector.broadcast %0 : vector<1x128xf32> to vector<128x128xf32>
    %7 = arith.addf %5, %6 : vector<128x128xf32>
    %cst_7 = arith.constant 0.000000e+00 : f32
    %8 = vector.broadcast %cst_7 : f32 to vector<128x128xf32>
    %9 = arith.maximumf %7, %8 : vector<128x128xf32>
    %10 = arith.truncf %9 : vector<128x128xf32> to vector<128x128xbf16>
    %c0_8 = arith.constant 0 : index
    %c0_9 = arith.constant 0 : index
    %11 = vector.load %arg3[%c0_8, %c0_9] : memref<128x128xbf16, #tpu.memory_space<vmem>>, vector<128x128xbf16>
    %cst_10 = arith.constant dense<0.000000e+00> : vector<128x128xf32>
    %12 = tpu.matmul %10, %11, %cst_10 {dimension_numbers = #tpu.dot_dimension_numbers<[1], [0], [0], [1], [0, 0, 1, 1], [], []>} : vector<128x128xbf16>, vector<128x128xbf16>, vector<128x128xf32> -> vector<128x128xf32>
    %13 = vector.broadcast %1 : vector<1x128xf32> to vector<128x128xf32>
    %14 = arith.addf %12, %13 : vector<128x128xf32>
    %cst_11 = arith.constant 0.000000e+00 : f32
    %15 = vector.broadcast %cst_11 : f32 to vector<128x128xf32>
    %16 = arith.maximumf %14, %15 : vector<128x128xf32>
    %17 = arith.truncf %16 : vector<128x128xf32> to vector<128x128xbf16>
    %c0_12 = arith.constant 0 : index
    %c0_13 = arith.constant 0 : index
    %18 = vector.load %arg4[%c0_12, %c0_13] : memref<128x128xbf16, #tpu.memory_space<vmem>>, vector<128x128xbf16>
    %cst_14 = arith.constant dense<0.000000e+00> : vector<128x128xf32>
    %19 = tpu.matmul %17, %18, %cst_14 {dimension_numbers = #tpu.dot_dimension_numbers<[1], [0], [0], [1], [0, 0, 1, 1], [], []>} : vector<128x128xbf16>, vector<128x128xbf16>, vector<128x128xf32> -> vector<128x128xf32>
    %20 = vector.broadcast %2 : vector<1x128xf32> to vector<128x128xf32>
    %21 = arith.addf %19, %20 : vector<128x128xf32>
    %22 = arith.negf %21 : vector<128x128xf32>
    %23 = math.exp %22 : vector<128x128xf32>
    %cst_15 = arith.constant 1.000000e+00 : f32
    %24 = vector.broadcast %cst_15 : f32 to vector<128x128xf32>
    %25 = arith.addf %24, %23 : vector<128x128xf32>
    %26 = arith.divf %24, %25 : vector<128x128xf32>
    %c0_16 = arith.constant 0 : index
    %c0_17 = arith.constant 0 : index
    %27 = vector.load %arg6[%c0_16, %c0_17] : memref<128x128xf32, #tpu.memory_space<vmem>>, vector<128x128xf32>
    tpu.vector_store %arg6[%c0_16, %c0_17], %26 {strides = array<i32>} : memref<128x128xf32, #tpu.memory_space<vmem>>, vector<128x128xf32>,
    return
  }
  func.func @transform_0(%arg0: i32) -> (i32, i32) {
    %c0_i32 = arith.constant 0 : i32
    %c0_i32_0 = arith.constant 0 : i32
    return %arg0, %c0_i32 : i32, i32
  }
  func.func @transform_1(%arg0: i32) -> (i32, i32) {
    %c0_i32 = arith.constant 0 : i32
    %c0_i32_0 = arith.constant 0 : i32
    %c0_i32_1 = arith.constant 0 : i32
    return %c0_i32, %c0_i32_0 : i32, i32
  }
  func.func @transform_2(%arg0: i32) -> (i32, i32) {
    %c0_i32 = arith.constant 0 : i32
    %c0_i32_0 = arith.constant 0 : i32
    %c0_i32_1 = arith.constant 0 : i32
    return %c0_i32, %c0_i32_0 : i32, i32
  }
  func.func @transform_3(%arg0: i32) -> (i32, i32) {
    %c0_i32 = arith.constant 0 : i32
    %c0_i32_0 = arith.constant 0 : i32
    %c0_i32_1 = arith.constant 0 : i32
    return %c0_i32, %c0_i32_0 : i32, i32
  }
  func.func @transform_4(%arg0: i32) -> (i32, i32) {
    %c0_i32 = arith.constant 0 : i32
    %c0_i32_0 = arith.constant 0 : i32
    %c0_i32_1 = arith.constant 0 : i32
    return %c0_i32, %c0_i32_0 : i32, i32
  }
  func.func @transform_5(%arg0: i32) -> (i32, i32) {
    %c0_i32 = arith.constant 0 : i32
    %c0_i32_0 = arith.constant 0 : i32
    return %arg0, %c0_i32 : i32, i32
  }
}

</mosaic_0001>

<bundles_post_ra>
// kernel: classifier_forward.1
= control target key start
LH: loop header
LB: loop body
LE: loop exit
PB: predicated region body
PF: predicated region fallthrough
CT: control target
= control target key end

     0   :  { %10 = vsyncpa [#allocation3], 0  ;;  %s2050_s0 = inlined_call_operand.vmem [shape: bf16[128,512], index: 0, kind: input, shape index: {}]   ;;  %s2051_s1 = inlined_call_operand.vmem [shape: bf16[512,128], index: 1, kind: input, shape index: {}]   ;;  %s2052_s2 = inlined_call_operand.hbm [shape: bf16[128,128], index: 2, kind: input, shape index: {}]   ;;  %s2053_s3 = inlined_call_operand.hbm [shape: bf16[128,128], index: 3, kind: input, shape index: {}]   ;;  %s2054_s4 = inlined_call_operand.vmem [shape: f32[8,128], index: 4, kind: input, shape index: {}]   ;;  %s2055_s5 = inlined_call_operand.vmem [shape: f32[128,128], index: 5, kind: output, shape index: {}]  }
   0x1   :  { %11 = vsyncpa [#allocation5], 0  ;;  %s1725_s18 = smov [#allocation2]  }
   0x2   :  { %s21_s19 = sshll.u32 %s1725_s18, 4  ;;  %s22_s19 = int_to_ptr.vmem [resolvable:$true] %s21_s19 }
   0x3   :  { %s1689_s20 = scalar_lea.vmem %s22_s19, 1024  ;;  %p1694_p1 = scmp.lt.s32.totalorder %s22_s19, %s22_s19 }
   0x4   :  { %p1690_p0 = scmp.ne.s32.totalorder %s22_s19, %s1689_s20  ;;  %p1695_p2 = scmp.lt.s32.totalorder %s1689_s20, %s1689_s20 }
   0x6   :  { %p1696_p3 = por %p1695_p2, %p1694_p1 }
   0x8   :  { %p1697_p4 = pnand %p1696_p3, %p1690_p0 }
   0xa   :  { %1700 = shalt.err (!%p1697_p4)
}
   0xb   :  { %s1726_s21 = smov 64   ;;  %s1727_s22 = smov 4  }
   0xc   :  { %27 = dma.hbm_to_vmem [thread:$0]  %s2052_s2, 1024, %s22_s19, [#allocation3], %s1726_s21, %s1726_s21, %s1727_s22  }
   0xd   :  { %s1728_s25 = smov [#allocation4]  }
   0xe   :  { %s33_s26 = sshll.u32 %s1728_s25, 4  ;;  %s34_s26 = int_to_ptr.vmem [resolvable:$true] %s33_s26 }
   0xf   :  { %s1709_s27 = scalar_lea.vmem %s34_s26, 1024  ;;  %p1714_p6 = scmp.lt.s32.totalorder %s34_s26, %s34_s26 }
  0x10   :  { %p1710_p5 = scmp.ne.s32.totalorder %s34_s26, %s1709_s27  ;;  %p1715_p7 = scmp.lt.s32.totalorder %s1709_s27, %s1709_s27 }
  0x12   :  { %p1716_p8 = por %p1715_p7, %p1714_p6 }
  0x14   :  { %p1717_p9 = pnand %p1716_p8, %p1710_p5 }
  0x16   :  { %1720 = shalt.err (!%p1717_p9)
}
  0x17   :  { %39 = dma.hbm_to_vmem [thread:$0]  %s2053_s3, 1024, %s34_s26, [#allocation5], %s1726_s21, %s1726_s21, %s1727_s22  }
  0x18   :  { %1721 = dma.done.wait [#allocation3], 1024  }
  0x19   :  { %1722 = vsyncadd [#allocation3], 4294966272 }
  0x1a   :  { %1723 = dma.done.wait [#allocation5], 1024  }
  0x1b   :  { %1724 = vsyncadd [#allocation5], 4294966272  ;;  %v1521_v0 = vld [vmem:[%s2051_s1 + $0x78] sm:$0xff]   ;;  %v1525_v4 = vld [vmem:[%s2051_s1 + $0x70] sm:$0xff]  }
  0x1c   :  { %v1522_v1 = vld [vmem:[%s2051_s1 + $0xf8] sm:$0xff]   ;;  %1293 = vmatprep.subr.bf16.mxu0 %v1521_v0  ;;  %v1526_v5 = vld [vmem:[%s2051_s1 + $0xf0] sm:$0xff]   ;;  %v1529_v8 = vld [vmem:[%s2051_s1 + $0x68] sm:$0xff]  }
  0x1d   :  { %v1523_v2 = vld [vmem:[%s2051_s1 + $0x38] sm:$0xff]   ;;  %1357 = vmatprep.subr.bf16.mxu1 %v1522_v1  ;;  %v1527_v6 = vld [vmem:[%s2051_s1 + $0x30] sm:$0xff]   ;;  %v1530_v9 = vld [vmem:[%s2051_s1 + $0xe8] sm:$0xff]  }
  0x1e   :  { %v1524_v3 = vld [vmem:[%s2051_s1 + $0xb8] sm:$0xff]   ;;  %1294 = vmatpush3.bf16.msra.mxu0 %v1523_v2  ;;  %v1528_v7 = vld [vmem:[%s2051_s1 + $0xb0] sm:$0xff]   ;;  %v1531_v10 = vld [vmem:[%s2051_s1 + $0x28] sm:$0xff]  }
  0x1f   :  { %1358 = vmatpush3.bf16.msra.mxu1 %v1524_v3  ;;  %1295 = vmatprep.subr.bf16.mxu0 %v1525_v4  ;;  %v1532_v11 = vld [vmem:[%s2051_s1 + $0xa8] sm:$0xff]   ;;  %v1533_v12 = vld [vmem:[%s2051_s1 + $0x60] sm:$0xff]   ;;  %v1537_v16 = vld [vmem:[%s2051_s1 + $0x58] sm:$0xff]  }
  0x20   :  { %1359 = vmatprep.subr.bf16.mxu1 %v1526_v5  ;;  %v1534_v13 = vld [vmem:[%s2051_s1 + $0xe0] sm:$0xff]   ;;  %v1538_v17 = vld [vmem:[%s2051_s1 + $0xd8] sm:$0xff]   ;;  %v1541_v20 = vld [vmem:[%s2051_s1 + $0x50] sm:$0xff]  }
  0x21   :  { %v1535_v14 = vld [vmem:[%s2051_s1 + $0x20] sm:$0xff]   ;;  %v1539_v18 = vld [vmem:[%s2051_s1 + $0x18] sm:$0xff]   ;;  %v1542_v21 = vld [vmem:[%s2051_s1 + $0xd0] sm:$0xff]  }
  0x22   :  { %1296 = vmatpush3.bf16.msra.mxu0 %v1527_v6  ;;  %v1536_v15 = vld [vmem:[%s2051_s1 + $0xa0] sm:$0xff]   ;;  %v1540_v19 = vld [vmem:[%s2051_s1 + $0x98] sm:$0xff]   ;;  %v1543_v22 = vld [vmem:[%s2051_s1 + $0x10] sm:$0xff]  }
  0x23   :  { %1360 = vmatpush3.bf16.msra.mxu1 %v1528_v7  ;;  %1297 = vmatprep.subr.bf16.mxu0 %v1529_v8  ;;  %v1544_v23 = vld [vmem:[%s2051_s1 + $0x90] sm:$0xff]   ;;  %v1545_v24 = vld [vmem:[%s2051_s1 + $0x48] sm:$0xff]   ;;  %v1549_v28 = vld [vmem:[%s2051_s1 + $0x40] sm:$0xff]  }
  0x24   :  { %1361 = vmatprep.subr.bf16.mxu1 %v1530_v9  ;;  %v1546_v25 = vld [vmem:[%s2051_s1 + $0xc8] sm:$0xff]   ;;  %v1550_v29 = vld [vmem:[%s2051_s1 + $0xc0] sm:$0xff]   ;;  %v1601_v47 = vld [vmem:[#allocation2 + $0x38] sm:$0xff]  }
  0x25   :  { %v1547_v26 = vld [vmem:[%s2051_s1 + $0x8] sm:$0xff]   ;;  %v1551_v30 = vld [vmem:[%s2051_s1] sm:$0xff]   ;;  %v1602_v50 = vld [vmem:[#allocation2 + $0x30] sm:$0xff]  }
  0x26   :  { %1298 = vmatpush3.bf16.msra.mxu0 %v1531_v10  ;;  %v1548_v27 = vld [vmem:[%s2051_s1 + $0x88] sm:$0xff]   ;;  %v1552_v31 = vld [vmem:[%s2051_s1 + $0x80] sm:$0xff]   ;;  %v1605_v4 = vld [vmem:[#allocation2 + $0x18] sm:$0xff]  }
  0x27   :  { %1362 = vmatpush3.bf16.msra.mxu1 %v1532_v11  ;;  %1299 = vmatprep.subr.bf16.mxu0 %v1533_v12  ;;  %v1553_v32 = vld [vmem:[%s2050_s0] ss:$16 sps:$4 sm:$0xff]   ;;  %v1555_v33 = vld [vmem:[%s2050_s0 + $0x4] ss:$16 sps:$4 sm:$0xff]   ;;  %v1556_v34 = vld [vmem:[%s2050_s0 + $0x8] ss:$16 sps:$4 sm:$0xff]  }
  0x28   :  { %1363 = vmatprep.subr.bf16.mxu1 %v1534_v13  ;;  %v1558_v35 = vld [vmem:[%s2050_s0 + $0xc] ss:$16 sps:$4 sm:$0xff]   ;;  %536 = vmatprep.mubr.bf16.mxu0 %v1555_v33  ;;  %v1559_v36 = vld [vmem:[%s2050_s0 + $0x24] ss:$16 sps:$4 sm:$0xff]   ;;  %v1563_v38 = vld [vmem:[%s2050_s0 + $0x20] ss:$16 sps:$4 sm:$0xff]  }
  0x29   :  { %633 = vmatprep.mubr.bf16.mxu1 %v1558_v35  ;;  %v1561_v37 = vld [vmem:[%s2050_s0 + $0x2c] ss:$16 sps:$4 sm:$0xff]   ;;  %v1564_v39 = vld [vmem:[%s2050_s0 + $0x28] ss:$16 sps:$4 sm:$0xff]   ;;  %v1565_v40 = vld [vmem:[%s2050_s0 + $0x44] ss:$16 sps:$4 sm:$0xff]  }
  0x2a   :  { %1300 = vmatpush3.bf16.msra.mxu0 %v1535_v14  ;;  %v1567_v41 = vld [vmem:[%s2050_s0 + $0x4c] ss:$16 sps:$4 sm:$0xff]   ;;  %v1569_v42 = vld [vmem:[%s2050_s0 + $0x40] ss:$16 sps:$4 sm:$0xff]   ;;  %v1570_v43 = vld [vmem:[%s2050_s0 + $0x48] ss:$16 sps:$4 sm:$0xff]  }
  0x2b   :  { %1364 = vmatpush3.bf16.msra.mxu1 %v1536_v15  ;;  %1301 = vmatprep.subr.bf16.mxu0 %v1537_v16  ;;  %v1571_v44 = vld [vmem:[%s2050_s0 + $0x64] ss:$16 sps:$4 sm:$0xff]   ;;  %v1573_v45 = vld [vmem:[%s2050_s0 + $0x6c] ss:$16 sps:$4 sm:$0xff]   ;;  %v1575_v46 = vld [vmem:[%s2050_s0 + $0x60] ss:$16 sps:$4 sm:$0xff]  }
  0x2c   :  { %1365 = vmatprep.subr.bf16.mxu1 %v1538_v17  ;;  %v1576_v48 = vld [vmem:[%s2050_s0 + $0x68] ss:$16 sps:$4 sm:$0xff]   ;;  %v1577_v49 = vld [vmem:[%s2050_s0 + $0x84] ss:$16 sps:$4 sm:$0xff]   ;;  %v1579_v51 = vld [vmem:[%s2050_s0 + $0x8c] ss:$16 sps:$4 sm:$0xff]  }
  0x2d   :  { %v1581_v52 = vld [vmem:[%s2050_s0 + $0x80] ss:$16 sps:$4 sm:$0xff]   ;;  %v1582_v53 = vld [vmem:[%s2050_s0 + $0x88] ss:$16 sps:$4 sm:$0xff]   ;;  %v1583_v54 = vld [vmem:[%s2050_s0 + $0xa4] ss:$16 sps:$4 sm:$0xff]  }
  0x2e   :  { %1302 = vmatpush3.bf16.msra.mxu0 %v1539_v18  ;;  %v1585_v55 = vld [vmem:[%s2050_s0 + $0xac] ss:$16 sps:$4 sm:$0xff]   ;;  %v1587_v56 = vld [vmem:[%s2050_s0 + $0xa0] ss:$16 sps:$4 sm:$0xff]   ;;  %v1588_v57 = vld [vmem:[%s2050_s0 + $0xa8] ss:$16 sps:$4 sm:$0xff]  }
  0x2f   :  { %1366 = vmatpush3.bf16.msra.mxu1 %v1540_v19  ;;  %1303 = vmatprep.subr.bf16.mxu0 %v1541_v20  ;;  %v1589_v58 = vld [vmem:[%s2050_s0 + $0xc4] ss:$16 sps:$4 sm:$0xff]   ;;  %v1591_v59 = vld [vmem:[%s2050_s0 + $0xcc] ss:$16 sps:$4 sm:$0xff]   ;;  %v1593_v60 = vld [vmem:[%s2050_s0 + $0xc0] ss:$16 sps:$4 sm:$0xff]  }
  0x30   :  { %1367 = vmatprep.subr.bf16.mxu1 %v1542_v21  ;;  %v1594_v61 = vld [vmem:[%s2050_s0 + $0xc8] ss:$16 sps:$4 sm:$0xff]   ;;  %v1595_v62 = vld [vmem:[%s2050_s0 + $0xe4] ss:$16 sps:$4 sm:$0xff]   ;;  %v1597_v63 = vld [vmem:[%s2050_s0 + $0xec] ss:$16 sps:$4 sm:$0xff]  }
  0x31   :  { %v1599_v0 = vld [vmem:[%s2050_s0 + $0xe0] ss:$16 sps:$4 sm:$0xff]   ;;  %v1600_v1 = vld [vmem:[%s2050_s0 + $0xe8] ss:$16 sps:$4 sm:$0xff]  }
  0x32   :  { %1304 = vmatpush3.bf16.msra.mxu0 %v1543_v22  ;;  %v1603_v2 = vld [vmem:[#allocation2 + $0x28] sm:$0xff]   ;;  %v1604_v3 = vld [vmem:[#allocation2 + $0x20] sm:$0xff]   ;;  %v1606_v5 = vld [vmem:[#allocation2 + $0x10] sm:$0xff]  }
  0x33   :  { %1368 = vmatpush3.bf16.msra.mxu1 %v1544_v23  ;;  %1305 = vmatprep.subr.bf16.mxu0 %v1545_v24  ;;  %v1607_v6 = vld [vmem:[#allocation2 + $0x8] sm:$0xff]   ;;  %v1608_v7 = vld [vmem:[#allocation2] sm:$0xff]   ;;  %v1609_v8 = vld [vmem:[#allocation4 + $0x38] sm:$0xff]  }
  0x34   :  { %1369 = vmatprep.subr.bf16.mxu1 %v1546_v25  ;;  %v1610_v9 = vld [vmem:[#allocation4 + $0x30] sm:$0xff]   ;;  %v1611_v10 = vld [vmem:[#allocation4 + $0x28] sm:$0xff]   ;;  %v1612_v11 = vld [vmem:[#allocation4 + $0x20] sm:$0xff]  }
  0x35   :  { %v1613_v12 = vld [vmem:[#allocation4 + $0x18] sm:$0xff]   ;;  %v1960_v15 = vld [vmem:[%s2054_s4] ss:$0 sm:$0xff] }
  0x36   :  { %1306 = vmatpush3.bf16.msra.mxu0 %v1547_v26 }
  0x37   :  { %1370 = vmatpush3.bf16.msra.mxu1 %v1548_v27  ;;  %1307 = vmatprep.subr.bf16.mxu0 %v1549_v28 }
  0x38   :  { %1371 = vmatprep.subr.bf16.mxu1 %v1550_v29 }
  0x3a   :  { %1308 = vmatpush3.bf16.msra.mxu0 %v1551_v30 }
  0x3b   :  { %1372 = vmatpush3.bf16.msra.mxu1 %v1552_v31  ;;  %1453 = vmatprep.subr.bf16.mxu0 %v1601_v47 }
  0x3c   :  { %1485 = vmatprep.subr.bf16.mxu1 %v1609_v8 }
  0x3d   :  { %537 = vmatmul.mubr.bf16.vlgmr.msra.gmra.mxu0 %v1553_v32 }
  0x3e   :  { %634 = vmatmul.mubr.bf16.vlgmr.msra.gmra.mxu1 %v1556_v34  ;;  %544 = vmatprep.mubr.bf16.mxu0 %v1559_v36 }
  0x3f   :  { %641 = vmatprep.mubr.bf16.mxu1 %v1561_v37  ;;  %1454 = vmatpush3.bf16.msra.mxu0 %v1601_v47 }
  0x40   :  { %1455 = vmatprep.subr.bf16.mxu0 %v1602_v50  ;;  %1486 = vmatpush3.bf16.msra.mxu1 %v1609_v8 }
  0x41   :  { %1487 = vmatprep.subr.bf16.mxu1 %v1610_v9 }
  0x43   :  { %1456 = vmatpush3.bf16.msra.mxu0 %v1602_v50 }
  0x44   :  { %1457 = vmatprep.subr.bf16.mxu0 %v1603_v2  ;;  %1488 = vmatpush3.bf16.msra.mxu1 %v1610_v9 }
  0x45   :  { %545 = vmatmul.mubr.bf16.gmra.mxu0 %v1563_v38  ;;  %1489 = vmatprep.subr.bf16.mxu1 %v1611_v10 }
  0x46   :  { %642 = vmatmul.mubr.bf16.gmra.mxu1 %v1564_v39  ;;  %552 = vmatprep.mubr.bf16.mxu0 %v1565_v40 }
  0x47   :  { %649 = vmatprep.mubr.bf16.mxu1 %v1567_v41  ;;  %1458 = vmatpush3.bf16.msra.mxu0 %v1603_v2 }
  0x48   :  { %1459 = vmatprep.subr.bf16.mxu0 %v1604_v3  ;;  %1490 = vmatpush3.bf16.msra.mxu1 %v1611_v10 }
  0x49   :  { %1491 = vmatprep.subr.bf16.mxu1 %v1612_v11 }
  0x4b   :  { %1460 = vmatpush3.bf16.msra.mxu0 %v1604_v3 }
  0x4c   :  { %1461 = vmatprep.subr.bf16.mxu0 %v1605_v4  ;;  %1492 = vmatpush3.bf16.msra.mxu1 %v1612_v11 }
  0x4d   :  { %553 = vmatmul.mubr.bf16.gmra.mxu0 %v1569_v42  ;;  %1493 = vmatprep.subr.bf16.mxu1 %v1613_v12 }
  0x4e   :  { %650 = vmatmul.mubr.bf16.gmra.mxu1 %v1570_v43  ;;  %560 = vmatprep.mubr.bf16.mxu0 %v1571_v44 }
  0x4f   :  { %657 = vmatprep.mubr.bf16.mxu1 %v1573_v45  ;;  %1462 = vmatpush3.bf16.msra.mxu0 %v1605_v4 }
  0x50   :  { %1463 = vmatprep.subr.bf16.mxu0 %v1606_v5  ;;  %1494 = vmatpush3.bf16.msra.mxu1 %v1613_v12 }
  0x53   :  { %1464 = vmatpush3.bf16.msra.mxu0 %v1606_v5 }
  0x54   :  { %1465 = vmatprep.subr.bf16.mxu0 %v1607_v6 }
  0x55   :  { %561 = vmatmul.mubr.bf16.gmra.mxu0 %v1575_v46 }
  0x56   :  { %658 = vmatmul.mubr.bf16.gmra.mxu1 %v1576_v48  ;;  %568 = vmatprep.mubr.bf16.mxu0 %v1577_v49 }
  0x57   :  { %665 = vmatprep.mubr.bf16.mxu1 %v1579_v51  ;;  %1466 = vmatpush3.bf16.msra.mxu0 %v1607_v6 }
  0x58   :  { %1467 = vmatprep.subr.bf16.mxu0 %v1608_v7 }
  0x5b   :  { %1468 = vmatpush3.bf16.msra.mxu0 %v1608_v7 }
  0x5d   :  { %569 = vmatmul.mubr.bf16.gmra.mxu0 %v1581_v52 }
  0x5e   :  { %666 = vmatmul.mubr.bf16.gmra.mxu1 %v1582_v53  ;;  %576 = vmatprep.mubr.bf16.mxu0 %v1583_v54 }
  0x5f   :  { %673 = vmatprep.mubr.bf16.mxu1 %v1585_v55 }
  0x65   :  { %577 = vmatmul.mubr.bf16.gmra.mxu0 %v1587_v56 }
  0x66   :  { %674 = vmatmul.mubr.bf16.gmra.mxu1 %v1588_v57  ;;  %584 = vmatprep.mubr.bf16.mxu0 %v1589_v58 }
  0x67   :  { %681 = vmatprep.mubr.bf16.mxu1 %v1591_v59 }
  0x6d   :  { %585 = vmatmul.mubr.bf16.gmra.mxu0 %v1593_v60 }
  0x6e   :  { %682 = vmatmul.mubr.bf16.gmra.mxu1 %v1594_v61  ;;  %592 = vmatprep.mubr.bf16.mxu0 %v1595_v62 }
  0x6f   :  { %689 = vmatprep.mubr.bf16.mxu1 %v1597_v63 }
  0x75   :  { %593 = vmatmul.mubr.bf16.gmra.mxu0 %v1599_v0 }
  0x76   :  { %690 = vmatmul.mubr.bf16.gmra.mxu1 %v1600_v1 }
  0xfd   :  { %v1309_v13 = vpop.f32.mrf.mxu0 }
  0xfe   :  { %v1373_v14 = vpop.f32.mrf.mxu1 }
  0xff   :  { %v1310_v16 = vpop.f32.mrf.mxu0 }
 0x100   :  { %v1311_v17 = vadd.f32 %v1310_v16, %v1309_v13  ;;  %v1374_v18 = vpop.f32.mrf.mxu1 }
 0x101   :  { %v1312_v19 = vpop.f32.mrf.mxu0  ;;  %v1375_v23 = vadd.f32 %v1374_v18, %v1373_v14 }
 0x102   :  { %v539_v20 = vadd.f32 %v1311_v17, %v1960_v15  ;;  %v1376_v21 = vpop.f32.mrf.mxu1 }
 0x103   :  { %v1313_v22 = vpop.f32.mrf.mxu0 }
 0x104   :  { %v1314_v24 = vadd.f32 %v1313_v22, %v1312_v19  ;;  %v1377_v25 = vpop.f32.mrf.mxu1  ;;  %v636_v27 = vadd.f32 %v1375_v23, %v539_v20 }
 0x105   :  { %v1315_v26 = vpop.f32.mrf.mxu0  ;;  %v1378_v29 = vadd.f32 %v1377_v25, %v1376_v21 }
 0x106   :  { %v542_v28 = vadd.f32 %v1314_v24, %v1960_v15  ;;  %v1379_v30 = vpop.f32.mrf.mxu1  ;;  %v698_v36 = vmax.f32 %v636_v27, 0.0 }
 0x107   :  { %v1316_v31 = vpop.f32.mrf.mxu0 }
 0x108   :  { %v639_v32 = vadd.f32 %v1378_v29, %v542_v28  ;;  %v1317_v33 = vadd.f32 %v1316_v31, %v1315_v26  ;;  %v1380_v34 = vpop.f32.mrf.mxu1 }
 0x109   :  { %v1318_v35 = vpop.f32.mrf.mxu0  ;;  %v1381_v41 = vadd.f32 %v1380_v34, %v1379_v30 }
 0x10a   :  { %v699_v37 = vmax.f32 %v639_v32, 0.0  ;;  %v547_v38 = vadd.f32 %v1317_v33, %v1960_v15  ;;  %v1382_v39 = vpop.f32.mrf.mxu1 }
 0x10b   :  { %v1319_v40 = vpop.f32.mrf.mxu0 }
 0x10c   :  { %v1320_v42 = vadd.f32 %v1319_v40, %v1318_v35  ;;  %v1383_v43 = vpop.f32.mrf.mxu1  ;;  %v714_v44 = vpack.c.bf16 %v699_v37, %v698_v36  ;;  %v644_v46 = vadd.f32 %v1381_v41, %v547_v38 }
 0x10d   :  { %v1321_v45 = vpop.f32.mrf.mxu0  ;;  %v1384_v48 = vadd.f32 %v1383_v43, %v1382_v39 }
 0x10e   :  { %v550_v47 = vadd.f32 %v1320_v42, %v1960_v15  ;;  %v1385_v49 = vpop.f32.mrf.mxu1  ;;  %1469 = vmatprep.mubr.bf16.mxu0 %v714_v44  ;;  %v700_v55 = vmax.f32 %v644_v46, 0.0 }
 0x10f   :  { %v1322_v50 = vpop.f32.mrf.mxu0 }
 0x110   :  { %v647_v51 = vadd.f32 %v1384_v48, %v550_v47  ;;  %v1323_v52 = vadd.f32 %v1322_v50, %v1321_v45  ;;  %v1386_v53 = vpop.f32.mrf.mxu1 }
 0x111   :  { %v1324_v54 = vpop.f32.mrf.mxu0  ;;  %v1387_v61 = vadd.f32 %v1386_v53, %v1385_v49 }
 0x112   :  { %v701_v56 = vmax.f32 %v647_v51, 0.0  ;;  %v555_v57 = vadd.f32 %v1323_v52, %v1960_v15  ;;  %v1388_v58 = vpop.f32.mrf.mxu1 }
 0x113   :  { %v1325_v59 = vpop.f32.mrf.mxu0 }
 0x114   :  { %v715_v60 = vpack.c.bf16 %v701_v56, %v700_v55  ;;  %v1326_v62 = vadd.f32 %v1325_v59, %v1324_v54  ;;  %v1389_v63 = vpop.f32.mrf.mxu1  ;;  %v652_v1 = vadd.f32 %v1387_v61, %v555_v57 }
 0x115   :  { %v1327_v0 = vpop.f32.mrf.mxu0  ;;  %v1390_v3 = vadd.f32 %v1389_v63, %v1388_v58 }
 0x116   :  { %v558_v2 = vadd.f32 %v1326_v62, %v1960_v15  ;;  %v1391_v4 = vpop.f32.mrf.mxu1  ;;  %1470 = vmatmul.mubr.bf16.vlgmr.msra.gmra.mxu0 %v715_v60  ;;  %v702_v10 = vmax.f32 %v652_v1, 0.0 }
 0x117   :  { %v1328_v5 = vpop.f32.mrf.mxu0 }
 0x118   :  { %v655_v6 = vadd.f32 %v1390_v3, %v558_v2  ;;  %v1329_v7 = vadd.f32 %v1328_v5, %v1327_v0  ;;  %v1392_v8 = vpop.f32.mrf.mxu1 }
 0x119   :  { %v1330_v9 = vpop.f32.mrf.mxu0  ;;  %v1393_v16 = vadd.f32 %v1392_v8, %v1391_v4 }
 0x11a   :  { %v703_v11 = vmax.f32 %v655_v6, 0.0  ;;  %v563_v12 = vadd.f32 %v1329_v7, %v1960_v15  ;;  %v1394_v13 = vpop.f32.mrf.mxu1 }
 0x11b   :  { %v1331_v14 = vpop.f32.mrf.mxu0 }
 0x11c   :  { %v1332_v17 = vadd.f32 %v1331_v14, %v1330_v9  ;;  %v1395_v18 = vpop.f32.mrf.mxu1  ;;  %v716_v19 = vpack.c.bf16 %v703_v11, %v702_v10  ;;  %v660_v21 = vadd.f32 %v1393_v16, %v563_v12 }
 0x11d   :  { %v1333_v20 = vpop.f32.mrf.mxu0  ;;  %v1396_v23 = vadd.f32 %v1395_v18, %v1394_v13 }
 0x11e   :  { %v566_v22 = vadd.f32 %v1332_v17, %v1960_v15  ;;  %v1397_v24 = vpop.f32.mrf.mxu1  ;;  %1473 = vmatprep.mubr.bf16.mxu0 %v716_v19  ;;  %v704_v30 = vmax.f32 %v660_v21, 0.0 }
 0x11f   :  { %v1334_v25 = vpop.f32.mrf.mxu0 }
 0x120   :  { %v663_v26 = vadd.f32 %v1396_v23, %v566_v22  ;;  %v1335_v27 = vadd.f32 %v1334_v25, %v1333_v20  ;;  %v1398_v28 = vpop.f32.mrf.mxu1 }
 0x121   :  { %v1336_v29 = vpop.f32.mrf.mxu0  ;;  %v1399_v35 = vadd.f32 %v1398_v28, %v1397_v24 }
 0x122   :  { %v705_v31 = vmax.f32 %v663_v26, 0.0  ;;  %v571_v32 = vadd.f32 %v1335_v27, %v1960_v15  ;;  %v1400_v33 = vpop.f32.mrf.mxu1 }
 0x123   :  { %v1337_v34 = vpop.f32.mrf.mxu0 }
 0x124   :  { %v1338_v36 = vadd.f32 %v1337_v34, %v1336_v29  ;;  %v1401_v37 = vpop.f32.mrf.mxu1  ;;  %v717_v38 = vpack.c.bf16 %v705_v31, %v704_v30  ;;  %v668_v40 = vadd.f32 %v1399_v35, %v571_v32 }
 0x125   :  { %v1339_v39 = vpop.f32.mrf.mxu0  ;;  %v1402_v42 = vadd.f32 %v1401_v37, %v1400_v33 }
 0x126   :  { %v574_v41 = vadd.f32 %v1338_v36, %v1960_v15  ;;  %v1403_v43 = vpop.f32.mrf.mxu1  ;;  %1474 = vmatmul.mubr.bf16.gmra.mxu0 %v717_v38  ;;  %v706_v49 = vmax.f32 %v668_v40, 0.0  ;;  %v1614_v40 = vld [vmem:[#allocation4 + $0x10] sm:$0xff]  }
 0x127   :  { %v1340_v44 = vpop.f32.mrf.mxu0  ;;  %1495 = vmatprep.subr.bf16.mxu1 %v1614_v40 }
 0x128   :  { %v671_v45 = vadd.f32 %v1402_v42, %v574_v41  ;;  %v1341_v46 = vadd.f32 %v1340_v44, %v1339_v39  ;;  %v1404_v47 = vpop.f32.mrf.mxu1  ;;  %1496 = vmatpush3.bf16.msra.mxu1 %v1614_v40  ;;  %v1615_v41 = vld [vmem:[#allocation4 + $0x8] sm:$0xff]   ;;  %v1616_v42 = vld [vmem:[#allocation4] sm:$0xff]  }
 0x129   :  { %v1342_v48 = vpop.f32.mrf.mxu0  ;;  %v1405_v54 = vadd.f32 %v1404_v47, %v1403_v43  ;;  %1497 = vmatprep.subr.bf16.mxu1 %v1615_v41 }
 0x12a   :  { %v707_v50 = vmax.f32 %v671_v45, 0.0  ;;  %v579_v51 = vadd.f32 %v1341_v46, %v1960_v15  ;;  %v1406_v52 = vpop.f32.mrf.mxu1 }
 0x12b   :  { %v1343_v53 = vpop.f32.mrf.mxu0 }
 0x12c   :  { %v1344_v55 = vadd.f32 %v1343_v53, %v1342_v48  ;;  %v1407_v56 = vpop.f32.mrf.mxu1  ;;  %v718_v57 = vpack.c.bf16 %v707_v50, %v706_v49  ;;  %v676_v59 = vadd.f32 %v1405_v54, %v579_v51  ;;  %1498 = vmatpush3.bf16.msra.mxu1 %v1615_v41 }
 0x12d   :  { %v1345_v58 = vpop.f32.mrf.mxu0  ;;  %v1408_v61 = vadd.f32 %v1407_v56, %v1406_v52  ;;  %1499 = vmatprep.subr.bf16.mxu1 %v1616_v42 }
 0x12e   :  { %v582_v60 = vadd.f32 %v1344_v55, %v1960_v15  ;;  %v1409_v62 = vpop.f32.mrf.mxu1  ;;  %1477 = vmatprep.mubr.bf16.mxu0 %v718_v57  ;;  %v708_v4 = vmax.f32 %v676_v59, 0.0 }
 0x12f   :  { %v1346_v63 = vpop.f32.mrf.mxu0 }
 0x130   :  { %v679_v0 = vadd.f32 %v1408_v61, %v582_v60  ;;  %v1347_v1 = vadd.f32 %v1346_v63, %v1345_v58  ;;  %v1410_v2 = vpop.f32.mrf.mxu1  ;;  %1500 = vmatpush3.bf16.msra.mxu1 %v1616_v42 }
 0x131   :  { %v1348_v3 = vpop.f32.mrf.mxu0  ;;  %v1411_v9 = vadd.f32 %v1410_v2, %v1409_v62 }
 0x132   :  { %v709_v5 = vmax.f32 %v679_v0, 0.0  ;;  %v587_v6 = vadd.f32 %v1347_v1, %v1960_v15  ;;  %v1412_v7 = vpop.f32.mrf.mxu1 }
 0x133   :  { %v1349_v8 = vpop.f32.mrf.mxu0 }
 0x134   :  { %v1350_v10 = vadd.f32 %v1349_v8, %v1348_v3  ;;  %v1413_v11 = vpop.f32.mrf.mxu1  ;;  %v719_v12 = vpack.c.bf16 %v709_v5, %v708_v4  ;;  %v684_v14 = vadd.f32 %v1411_v9, %v587_v6 }
 0x135   :  { %v1351_v13 = vpop.f32.mrf.mxu0  ;;  %v1414_v17 = vadd.f32 %v1413_v11, %v1412_v7 }
 0x136   :  { %v590_v16 = vadd.f32 %v1350_v10, %v1960_v15  ;;  %v1415_v18 = vpop.f32.mrf.mxu1  ;;  %1478 = vmatmul.mubr.bf16.gmra.mxu0 %v719_v12  ;;  %v710_v24 = vmax.f32 %v684_v14, 0.0 }
 0x137   :  { %v1352_v19 = vpop.f32.mrf.mxu0 }
 0x138   :  { %v687_v20 = vadd.f32 %v1414_v17, %v590_v16  ;;  %v1353_v21 = vadd.f32 %v1352_v19, %v1351_v13  ;;  %v1416_v22 = vpop.f32.mrf.mxu1 }
 0x139   :  { %v1354_v23 = vpop.f32.mrf.mxu0  ;;  %v1417_v29 = vadd.f32 %v1416_v22, %v1415_v18 }
 0x13a   :  { %v711_v25 = vmax.f32 %v687_v20, 0.0  ;;  %v595_v26 = vadd.f32 %v1353_v21, %v1960_v15  ;;  %v1418_v27 = vpop.f32.mrf.mxu1 }
 0x13b   :  { %v1355_v28 = vpop.f32.mrf.mxu0 }
 0x13c   :  { %v1356_v30 = vadd.f32 %v1355_v28, %v1354_v23  ;;  %v1419_v31 = vpop.f32.mrf.mxu1  ;;  %v720_v32 = vpack.c.bf16 %v711_v25, %v710_v24  ;;  %v692_v33 = vadd.f32 %v1417_v29, %v595_v26 }
 0x13d   :  { %v1420_v35 = vadd.f32 %v1419_v31, %v1418_v27 }
 0x13e   :  { %v598_v34 = vadd.f32 %v1356_v30, %v1960_v15  ;;  %1481 = vmatprep.mubr.bf16.mxu0 %v720_v32  ;;  %v712_v37 = vmax.f32 %v692_v33, 0.0  ;;  %v1259_v15 = vld [vmem:[%s2054_s4 + $0x1] ss:$0 sm:$0xff] }
 0x140   :  { %v695_v36 = vadd.f32 %v1420_v35, %v598_v34 }
 0x142   :  { %v713_v38 = vmax.f32 %v695_v36, 0.0  ;;  %v1984_v36 = vld [vmem:[%s2054_s4 + $0x2] ss:$0 sm:$0xff] }
 0x144   :  { %v721_v39 = vpack.c.bf16 %v713_v38, %v712_v37 }
 0x146   :  { %1482 = vmatmul.mubr.bf16.gmra.mxu0 %v721_v39 }
 0x1d6   :  { %v1471_v43 = vpop.f32.mrf.mxu0 }
 0x1d7   :  { %v833_v48 = vadd.f32 %v1471_v43, %v1259_v15 }
 0x1d8   :  { %v824_v44 = vpop.f32.mrf.mxu0 }
 0x1d9   :  { %v825_v46 = vadd.f32 %v1259_v15, %v824_v44  ;;  %v889_v54 = vmax.f32 %v833_v48, 0.0 }
 0x1da   :  { %v1472_v45 = vpop.f32.mrf.mxu0 }
 0x1db   :  { %v836_v47 = vadd.f32 %v1472_v45, %v1259_v15  ;;  %v887_v52 = vmax.f32 %v825_v46, 0.0 }
 0x1dc   :  { %v827_v49 = vpop.f32.mrf.mxu0 }
 0x1dd   :  { %v828_v50 = vadd.f32 %v1259_v15, %v827_v49  ;;  %v890_v51 = vmax.f32 %v836_v47, 0.0 }
 0x1df   :  { %v888_v53 = vmax.f32 %v828_v50, 0.0  ;;  %v904_v56 = vpack.c.bf16 %v890_v51, %v889_v54 }
 0x1e1   :  { %v903_v55 = vpack.c.bf16 %v888_v53, %v887_v52 }
 0x1e3   :  { %1501 = vmatprep.mubr.bf16.mxu1 %v903_v55 }
 0x1e4   :  { %1502 = vmatmul.mubr.bf16.vlgmr.msra.gmra.mxu1 %v904_v56 }
 0x1e6   :  { %v1475_v57 = vpop.f32.mrf.mxu0 }
 0x1e7   :  { %v849_v62 = vadd.f32 %v1475_v57, %v1259_v15 }
 0x1e8   :  { %v840_v58 = vpop.f32.mrf.mxu0 }
 0x1e9   :  { %v841_v60 = vadd.f32 %v1259_v15, %v840_v58  ;;  %v893_v4 = vmax.f32 %v849_v62, 0.0 }
 0x1ea   :  { %v1476_v59 = vpop.f32.mrf.mxu0 }
 0x1eb   :  { %v852_v61 = vadd.f32 %v1476_v59, %v1259_v15  ;;  %v891_v2 = vmax.f32 %v841_v60, 0.0 }
 0x1ec   :  { %v843_v63 = vpop.f32.mrf.mxu0 }
 0x1ed   :  { %v844_v0 = vadd.f32 %v1259_v15, %v843_v63  ;;  %v894_v1 = vmax.f32 %v852_v61, 0.0 }
 0x1ef   :  { %v892_v3 = vmax.f32 %v844_v0, 0.0  ;;  %v906_v6 = vpack.c.bf16 %v894_v1, %v893_v4 }
 0x1f1   :  { %v905_v5 = vpack.c.bf16 %v892_v3, %v891_v2 }
 0x1f3   :  { %1505 = vmatprep.mubr.bf16.mxu1 %v905_v5 }
 0x1f4   :  { %1506 = vmatmul.mubr.bf16.gmra.mxu1 %v906_v6 }
 0x1f6   :  { %v1479_v7 = vpop.f32.mrf.mxu0 }
 0x1f7   :  { %v865_v12 = vadd.f32 %v1479_v7, %v1259_v15 }
 0x1f8   :  { %v856_v8 = vpop.f32.mrf.mxu0 }
 0x1f9   :  { %v857_v10 = vadd.f32 %v1259_v15, %v856_v8  ;;  %v897_v19 = vmax.f32 %v865_v12, 0.0 }
 0x1fa   :  { %v1480_v9 = vpop.f32.mrf.mxu0 }
 0x1fb   :  { %v868_v11 = vadd.f32 %v1480_v9, %v1259_v15  ;;  %v895_v17 = vmax.f32 %v857_v10, 0.0 }
 0x1fc   :  { %v859_v13 = vpop.f32.mrf.mxu0 }
 0x1fd   :  { %v860_v14 = vadd.f32 %v1259_v15, %v859_v13  ;;  %v898_v16 = vmax.f32 %v868_v11, 0.0 }
 0x1ff   :  { %v896_v18 = vmax.f32 %v860_v14, 0.0  ;;  %v908_v21 = vpack.c.bf16 %v898_v16, %v897_v19 }
 0x201   :  { %v907_v20 = vpack.c.bf16 %v896_v18, %v895_v17 }
 0x203   :  { %1509 = vmatprep.mubr.bf16.mxu1 %v907_v20 }
 0x204   :  { %1510 = vmatmul.mubr.bf16.gmra.mxu1 %v908_v21 }
 0x206   :  { %v1483_v22 = vpop.f32.mrf.mxu0 }
 0x207   :  { %v881_v27 = vadd.f32 %v1483_v22, %v1259_v15 }
 0x208   :  { %v872_v23 = vpop.f32.mrf.mxu0 }
 0x209   :  { %v873_v25 = vadd.f32 %v1259_v15, %v872_v23  ;;  %v901_v33 = vmax.f32 %v881_v27, 0.0 }
 0x20a   :  { %v1484_v24 = vpop.f32.mrf.mxu0 }
 0x20b   :  { %v884_v26 = vadd.f32 %v1484_v24, %v1259_v15  ;;  %v899_v31 = vmax.f32 %v873_v25, 0.0 }
 0x20c   :  { %v875_v28 = vpop.f32.mrf.mxu0 }
 0x20d   :  { %v876_v29 = vadd.f32 %v1259_v15, %v875_v28  ;;  %v902_v30 = vmax.f32 %v884_v26, 0.0 }
 0x20f   :  { %v900_v32 = vmax.f32 %v876_v29, 0.0  ;;  %v910_v35 = vpack.c.bf16 %v902_v30, %v901_v33 }
 0x211   :  { %v909_v34 = vpack.c.bf16 %v900_v32, %v899_v31 }
 0x213   :  { %1513 = vmatprep.mubr.bf16.mxu1 %v909_v34 }
 0x214   :  { %1514 = vmatmul.mubr.bf16.gmra.mxu1 %v910_v35 }
 0x2a4   :  { %v1503_v37 = vpop.f32.mrf.mxu1 }
 0x2a5   :  { %v1022_v38 = vadd.f32 %v1503_v37, %v1984_v36 }
 0x2a6   :  { %v1013_v39 = vpop.f32.mrf.mxu1 }
 0x2a7   :  { %v1279_v40 = vmul.f32 -1.442695, %v1022_v38  ;;  %v1014_v41 = vadd.f32 %v1984_v36, %v1013_v39 }
 0x2a8   :  { %v1504_v42 = vpop.f32.mrf.mxu1 }
 0x2a9   :  { %1617 = vpow2.f32 %v1279_v40  ;;  %v1277_v43 = vmul.f32 -1.442695, %v1014_v41  ;;  %v1025_v44 = vadd.f32 %v1504_v42, %v1984_v36 }
 0x2aa   :  { %v1016_v15 = vpop.f32.mrf.mxu1 }
 0x2ab   :  { %1619 = vpow2.f32 %v1277_v43  ;;  %v1280_v45 = vmul.f32 -1.442695, %v1025_v44  ;;  %v1017_v46 = vadd.f32 %v1984_v36, %v1016_v15 }
 0x2ad   :  { %1621 = vpow2.f32 %v1280_v45  ;;  %v1278_v47 = vmul.f32 -1.442695, %v1017_v46 }
 0x2af   :  { %1623 = vpow2.f32 %v1278_v47 }
 0x2b4   :  { %v1507_v48 = vpop.f32.mrf.mxu1 }
 0x2b5   :  { %v1038_v49 = vadd.f32 %v1507_v48, %v1984_v36 }
 0x2b6   :  { %v1618_v50 = vpop.eup %1617  ;;  %v1029_v51 = vpop.f32.mrf.mxu1 }
 0x2b7   :  { %v1126_v52 = vadd.f32 1.0, %v1618_v50  ;;  %v1283_v53 = vmul.f32 -1.442695, %v1038_v49  ;;  %v1030_v54 = vadd.f32 %v1984_v36, %v1029_v51 }
 0x2b8   :  { %v1620_v55 = vpop.eup %1619  ;;  %v1508_v56 = vpop.f32.mrf.mxu1 }
 0x2b9   :  { %1625 = vrcp.f32 %v1126_v52  ;;  %v1124_v57 = vadd.f32 1.0, %v1620_v55  ;;  %v1281_v58 = vmul.f32 -1.442695, %v1030_v54  ;;  %v1041_v59 = vadd.f32 %v1508_v56, %v1984_v36 }
 0x2ba   :  { %v1622_v60 = vpop.eup %1621  ;;  %1627 = vpow2.f32 %v1283_v53  ;;  %v1032_v61 = vpop.f32.mrf.mxu1 }
 0x2bb   :  { %1629 = vrcp.f32 %v1124_v57  ;;  %v1127_v62 = vadd.f32 1.0, %v1622_v60  ;;  %v1284_v63 = vmul.f32 -1.442695, %v1041_v59  ;;  %v1033_v0 = vadd.f32 %v1984_v36, %v1032_v61 }
 0x2bc   :  { %v1624_v1 = vpop.eup %1623  ;;  %1631 = vpow2.f32 %v1281_v58 }
 0x2bd   :  { %1633 = vrcp.f32 %v1127_v62  ;;  %v1125_v2 = vadd.f32 1.0, %v1624_v1  ;;  %v1282_v3 = vmul.f32 -1.442695, %v1033_v0 }
 0x2be   :  { %1635 = vpow2.f32 %v1284_v63 }
 0x2bf   :  { %1637 = vrcp.f32 %v1125_v2 }
 0x2c0   :  { %1639 = vpow2.f32 %v1282_v3 }
 0x2c4   :  { %v1511_v4 = vpop.f32.mrf.mxu1 }
 0x2c5   :  { %v1054_v5 = vadd.f32 %v1511_v4, %v1984_v36 }
 0x2c6   :  { %v1626_v6 = vpop.eup %1625  ;;  %v1045_v7 = vpop.f32.mrf.mxu1 }
 0x2c7   :  { %v1628_v8 = vpop.eup %1627  ;;  %1174 = vst [vmem:[%s2055_s5 + $0x10] sm:$0xff] %v1626_v6  ;;  %v1287_v9 = vmul.f32 -1.442695, %v1054_v5  ;;  %v1046_v10 = vadd.f32 %v1984_v36, %v1045_v7 }
 0x2c8   :  { %v1630_v11 = vpop.eup %1629  ;;  %v1130_v12 = vadd.f32 1.0, %v1628_v8  ;;  %v1512_v13 = vpop.f32.mrf.mxu1 }
 0x2c9   :  { %v1632_v14 = vpop.eup %1631  ;;  %1172 = vst [vmem:[%s2055_s5] sm:$0xff] %v1630_v11  ;;  %1641 = vpow2.f32 %v1287_v9  ;;  %v1285_v16 = vmul.f32 -1.442695, %v1046_v10  ;;  %v1057_v17 = vadd.f32 %v1512_v13, %v1984_v36 }
 0x2ca   :  { %v1634_v18 = vpop.eup %1633  ;;  %1643 = vrcp.f32 %v1130_v12  ;;  %v1128_v19 = vadd.f32 1.0, %v1632_v14  ;;  %v1048_v20 = vpop.f32.mrf.mxu1 }
 0x2cb   :  { %v1636_v21 = vpop.eup %1635  ;;  %1175 = vst [vmem:[%s2055_s5 + $0x18] sm:$0xff] %v1634_v18  ;;  %1645 = vpow2.f32 %v1285_v16  ;;  %v1288_v22 = vmul.f32 -1.442695, %v1057_v17  ;;  %v1049_v23 = vadd.f32 %v1984_v36, %v1048_v20 }
 0x2cc   :  { %v1638_v24 = vpop.eup %1637  ;;  %1647 = vrcp.f32 %v1128_v19  ;;  %v1131_v25 = vadd.f32 1.0, %v1636_v21 }
 0x2cd   :  { %v1640_v26 = vpop.eup %1639  ;;  %1173 = vst [vmem:[%s2055_s5 + $0x8] sm:$0xff] %v1638_v24  ;;  %1649 = vpow2.f32 %v1288_v22  ;;  %v1286_v27 = vmul.f32 -1.442695, %v1049_v23 }
 0x2ce   :  { %1651 = vrcp.f32 %v1131_v25  ;;  %v1129_v28 = vadd.f32 1.0, %v1640_v26 }
 0x2cf   :  { %1653 = vpow2.f32 %v1286_v27 }
 0x2d0   :  { %1655 = vrcp.f32 %v1129_v28 }
 0x2d4   :  { %v1515_v29 = vpop.f32.mrf.mxu1 }
 0x2d5   :  { %v1070_v30 = vadd.f32 %v1515_v29, %v1984_v36 }
 0x2d6   :  { %v1642_v31 = vpop.eup %1641  ;;  %v1061_v32 = vpop.f32.mrf.mxu1 }
 0x2d7   :  { %v1644_v33 = vpop.eup %1643  ;;  %v1134_v34 = vadd.f32 1.0, %v1642_v31  ;;  %v1291_v35 = vmul.f32 -1.442695, %v1070_v30  ;;  %v1062_v37 = vadd.f32 %v1984_v36, %v1061_v32 }
 0x2d8   :  { %v1646_v38 = vpop.eup %1645  ;;  %1178 = vst [vmem:[%s2055_s5 + $0x30] sm:$0xff] %v1644_v33  ;;  %v1516_v39 = vpop.f32.mrf.mxu1 }
 0x2d9   :  { %v1648_v40 = vpop.eup %1647  ;;  %1657 = vrcp.f32 %v1134_v34  ;;  %v1132_v41 = vadd.f32 1.0, %v1646_v38  ;;  %v1289_v42 = vmul.f32 -1.442695, %v1062_v37  ;;  %v1073_v43 = vadd.f32 %v1516_v39, %v1984_v36 }
 0x2da   :  { %v1650_v44 = vpop.eup %1649  ;;  %1176 = vst [vmem:[%s2055_s5 + $0x20] sm:$0xff] %v1648_v40  ;;  %1659 = vpow2.f32 %v1291_v35  ;;  %v1064_v15 = vpop.f32.mrf.mxu1 }
 0x2db   :  { %v1652_v45 = vpop.eup %1651  ;;  %1661 = vrcp.f32 %v1132_v41  ;;  %v1135_v46 = vadd.f32 1.0, %v1650_v44  ;;  %v1292_v47 = vmul.f32 -1.442695, %v1073_v43  ;;  %v1065_v48 = vadd.f32 %v1984_v36, %v1064_v15 }
 0x2dc   :  { %v1654_v49 = vpop.eup %1653  ;;  %1179 = vst [vmem:[%s2055_s5 + $0x38] sm:$0xff] %v1652_v45  ;;  %1663 = vpow2.f32 %v1289_v42 }
 0x2dd   :  { %v1656_v50 = vpop.eup %1655  ;;  %1665 = vrcp.f32 %v1135_v46  ;;  %v1133_v51 = vadd.f32 1.0, %v1654_v49  ;;  %v1290_v52 = vmul.f32 -1.442695, %v1065_v48 }
 0x2de   :  { %1177 = vst [vmem:[%s2055_s5 + $0x28] sm:$0xff] %v1656_v50  ;;  %1667 = vpow2.f32 %v1292_v47 }
 0x2df   :  { %1669 = vrcp.f32 %v1133_v51 }
 0x2e0   :  { %1671 = vpow2.f32 %v1290_v52 }
 0x2e6   :  { %v1658_v53 = vpop.eup %1657 }
 0x2e7   :  { %v1660_v54 = vpop.eup %1659  ;;  %1182 = vst [vmem:[%s2055_s5 + $0x50] sm:$0xff] %v1658_v53 }
 0x2e8   :  { %v1662_v36 = vpop.eup %1661  ;;  %v1138_v55 = vadd.f32 1.0, %v1660_v54 }
 0x2e9   :  { %v1664_v56 = vpop.eup %1663  ;;  %1180 = vst [vmem:[%s2055_s5 + $0x40] sm:$0xff] %v1662_v36 }
 0x2ea   :  { %v1666_v57 = vpop.eup %1665  ;;  %1673 = vrcp.f32 %v1138_v55  ;;  %v1136_v58 = vadd.f32 1.0, %v1664_v56 }
 0x2eb   :  { %v1668_v59 = vpop.eup %1667  ;;  %1183 = vst [vmem:[%s2055_s5 + $0x58] sm:$0xff] %v1666_v57 }
 0x2ec   :  { %v1670_v60 = vpop.eup %1669  ;;  %1675 = vrcp.f32 %v1136_v58  ;;  %v1139_v61 = vadd.f32 1.0, %v1668_v59 }
 0x2ed   :  { %v1672_v62 = vpop.eup %1671  ;;  %1181 = vst [vmem:[%s2055_s5 + $0x48] sm:$0xff] %v1670_v60 }
 0x2ee   :  { %1677 = vrcp.f32 %v1139_v61  ;;  %v1137_v63 = vadd.f32 1.0, %v1672_v62 }
 0x2f0   :  { %1679 = vrcp.f32 %v1137_v63 }
 0x2f7   :  { %v1674_v0 = vpop.eup %1673 }
 0x2f8   :  { %1186 = vst [vmem:[%s2055_s5 + $0x70] sm:$0xff] %v1674_v0 }
 0x2f9   :  { %v1676_v1 = vpop.eup %1675 }
 0x2fa   :  { %1184 = vst [vmem:[%s2055_s5 + $0x60] sm:$0xff] %v1676_v1 }
 0x2fb   :  { %v1678_v2 = vpop.eup %1677 }
 0x2fc   :  { %1187 = vst [vmem:[%s2055_s5 + $0x78] sm:$0xff] %v1678_v2 }
 0x2fd   :  { %v1680_v3 = vpop.eup %1679 }
 0x2fe   :  { %1185 = vst [vmem:[%s2055_s5 + $0x68] sm:$0xff] %v1680_v3 }
 0x2ff   :  { %1192 = vsyncpa [#allocation3], 1 }
 0x300   :  { %1193 = vsyncpa [#allocation5], 1 }

</bundles_post_ra>
